<compile_context>
chip_gen: v7x
topology: tpu7x:2x2x1
jax: 0.10.0
libtpu: 0.0.40
codegen_flags: <defaults>
</compile_context>

<pallas_src>
import jax
import jax.numpy as jnp
from jax.experimental import pallas as pl
from jax.experimental.pallas import tpu as pltpu


def _counter_kernel(idx_ref, att_w_ref, def_w_ref, b1_ref, w2_ref, b2_ref, out_ref):
    """One batch tile; batch on the lane axis.

    idx_ref   : (1, TB)    int32   packed indices: attacker | (defender << 16)
    att_w_ref : (H, C_pad) float32 attacker embedding folded through Linear1
    def_w_ref : (H, C_pad) float32 defender embedding folded through Linear1
    b1_ref    : (H, 1)     float32 Linear1 bias column
    w2_ref    : (H, 1)     float32 Linear2 weight column
    b2_ref    : (1,)       float32 Linear2 bias (SMEM scalar)
    out_ref   : (1, TB)    float32 sigmoid probabilities (lane-dense store)
    """
    C_pad = att_w_ref.shape[1]
    TB = idx_ref.shape[1]

    packed = idx_ref[...]                         # (1, TB) int32
    att = packed & 0xFFFF                         # (1, TB) attacker index
    dfn = (packed >> 16) & 0xFFFF                 # (1, TB) defender index (mask kills sign-extension)

    # Two small one-hots (single equality test each, no ORs, no bias row).
    c_iota = jax.lax.broadcasted_iota(jnp.int32, (C_pad, TB), 0)
    att_oh = (c_iota == att).astype(jnp.float32)  # (C_pad, TB)
    def_oh = (c_iota == dfn).astype(jnp.float32)  # (C_pad, TB)

    # Hidden layer: two MXU "gather via matmul" passes + bias broadcast + ReLU.
    h = jnp.dot(att_w_ref[...], att_oh, preferred_element_type=jnp.float32)   # (H, TB)
    h = h + jnp.dot(def_w_ref[...], def_oh, preferred_element_type=jnp.float32)
    h = jnp.maximum(h + b1_ref[...], 0.0)

    # Linear(H -> 1): VPU multiply + sublane reduce keeps the output lane-dense.
    logit = jnp.sum(h * w2_ref[...], axis=0, keepdims=True) + b2_ref[0]        # (1, TB)
    out_ref[...] = jax.nn.sigmoid(logit)


def prepare_counter_params(params):
    """One-time fold of Embedding + Linear(2E->H) into two resident (H, C_pad) tables.

    Call once per parameter set and reuse; running this inside every forward call can
    cost more than the kernel itself for small/medium batches.
    """
    att_emb = params["att_emb"].astype(jnp.float32)
    def_emb = params["def_emb"].astype(jnp.float32)
    w1 = params["w1"].astype(jnp.float32)
    b1 = params["b1"].astype(jnp.float32)
    w2 = params["w2"].astype(jnp.float32)
    b2 = params["b2"].astype(jnp.float32)

    C, E = att_emb.shape
    H = w1.shape[1]
    # concat([e_att, e_def]) @ W1 == e_att @ W1[:E] + e_def @ W1[E:]
    att_proj = att_emb @ w1[:E]                   # (C, H)
    def_proj = def_emb @ w1[E:]                   # (C, H)

    C_pad = ((C + 7) // 8) * 8                    # sublane-aligned contraction dim
    pad = ((0, 0), (0, C_pad - C))
    return {
        "att_w": jnp.pad(att_proj.T, pad),        # (H, C_pad)
        "def_w": jnp.pad(def_proj.T, pad),        # (H, C_pad)
        "b1": b1.reshape(H, 1),
        "w2": w2.reshape(H, 1),
        "b2": b2.reshape(1),
    }


def _choose_block_rows(B, C_pad, H):
    """Batch-tile width: as large as keeps fp32 intermediates (two one-hots + hidden)
    under ~6 MiB (safe for v7x's 64 MiB VMEM), capped at 8192; prefer an even tile
    count so the parallel grid axis shards across both v7x TensorCores."""
    budget = 6 * 1024 * 1024
    per_lane = (2 * C_pad + 2 * H) * 4            # bytes of intermediates per batch lane
    cap = min(8192, max(128, (budget // per_lane) // 128 * 128))
    tb = min(cap, max(128, ((B + 127) // 128) * 128))
    g = -(-B // tb)
    if g > 1 and g % 2 == 1:
        g_even = g + 1
        tb = max(128, ((-(-B // g_even) + 127) // 128) * 128)
    return tb


def counter_model_forward(attacker_idx, defender_idx, params, *, block_rows=None):
    """attacker_idx, defender_idx: (B,) int. `params` may be raw params or the output
    of prepare_counter_params. Returns (B,) float32 probabilities."""
    prepared = params if "att_w" in params else prepare_counter_params(params)
    att_w, def_w = prepared["att_w"], prepared["def_w"]
    b1, w2, b2 = prepared["b1"], prepared["w2"], prepared["b2"]
    H, C_pad = att_w.shape

    B = attacker_idx.shape[0]
    TB = block_rows if block_rows is not None else _choose_block_rows(B, C_pad, H)
    G = -(-B // TB)
    B_pad = G * TB

    # Pack both indices into one int32 per element (valid while num_champions < 65536):
    # half the index HBM traffic, one contiguous DMA per tile.
    att_i = attacker_idx.astype(jnp.int32)
    def_i = defender_idx.astype(jnp.int32)
    packed = ((att_i & 0xFFFF) | (def_i << 16)).reshape(1, B)
    packed = jnp.pad(packed, ((0, 0), (0, B_pad - B)))            # (1, B_pad)

    out = pl.pallas_call(
        _counter_kernel,
        out_shape=jax.ShapeDtypeStruct((1, B_pad), jnp.float32),
        grid=(G,),
        in_specs=[
            pl.BlockSpec((1, TB), lambda i: (0, i)),              # streamed packed indices
            pl.BlockSpec((H, C_pad), lambda i: (0, 0)),           # attacker table (resident)
            pl.BlockSpec((H, C_pad), lambda i: (0, 0)),           # defender table (resident)
            pl.BlockSpec((H, 1), lambda i: (0, 0)),               # b1 column (resident)
            pl.BlockSpec((H, 1), lambda i: (0, 0)),               # w2 column (resident)
            pl.BlockSpec(memory_space=pltpu.MemorySpace.SMEM),    # b2 scalar
        ],
        out_specs=pl.BlockSpec((1, TB), lambda i: (0, i)),        # lane-dense output
        compiler_params=pltpu.CompilerParams(
            dimension_semantics=("parallel",),                    # shard batch tiles across TCs
            vmem_limit_bytes=32 * 1024 * 1024,                    # safe on v5e/v6e/v7x
        ),
    )(packed, att_w, def_w, b1, w2, b2)

    return out[0, :B]   # drop tile padding; .squeeze()


def init_params(key, num_champions, emb_dim=8, hidden=32):
    k = jax.random.split(key, 6)
    # nn.Embedding default: N(0, 1); nn.Linear default: U(-1/sqrt(fan_in), 1/sqrt(fan_in))
    lim1 = 1.0 / jnp.sqrt(2.0 * emb_dim)
    lim2 = 1.0 / jnp.sqrt(float(hidden))
    return {
        "att_emb": jax.random.normal(k[0], (num_champions, emb_dim), jnp.float32),
        "def_emb": jax.random.normal(k[1], (num_champions, emb_dim), jnp.float32),
        "w1": jax.random.uniform(k[2], (2 * emb_dim, hidden), jnp.float32, -lim1, lim1),
        "b1": jax.random.uniform(k[3], (hidden,), jnp.float32, -lim1, lim1),
        "w2": jax.random.uniform(k[4], (hidden, 1), jnp.float32, -lim2, lim2),
        "b2": jax.random.uniform(k[5], (1,), jnp.float32, -lim2, lim2),
    }


def reference_forward(attacker_idx, defender_idx, params):
    e_att = params["att_emb"][attacker_idx]
    e_def = params["def_emb"][defender_idx]
    x = jnp.concatenate([e_att, e_def], axis=1)
    h = jnp.maximum(x @ params["w1"] + params["b1"], 0.0)
    return jax.nn.sigmoid(h @ params["w2"] + params["b2"])[:, 0]


if __name__ == "__main__":
    key = jax.random.PRNGKey(0)
    num_champions = 16
    emb_dim = 8
    hidden = 32
    batch = 8

    pkey, ikey1, ikey2 = jax.random.split(key, 3)
    params = init_params(pkey, num_champions, emb_dim=emb_dim, hidden=hidden)
    prepared = prepare_counter_params(params)   # one-time weight fold, hoisted out of the hot path

    attacker_idx = jax.random.randint(ikey1, (batch,), 0, num_champions, jnp.int32)
    defender_idx = jax.random.randint(ikey2, (batch,), 0, num_champions, jnp.int32)

    out = jax.block_until_ready(counter_model_forward(attacker_idx, defender_idx, prepared))
    ref = reference_forward(attacker_idx, defender_idx, params)
    assert out.shape == (batch,)
    assert jnp.allclose(out, ref, atol=1e-5, rtol=1e-5), (out, ref)

    # Multi-tile path with explicit small tiles + lane padding.
    big = 300
    bkey1, bkey2 = jax.random.split(jax.random.PRNGKey(1))
    a_big = jax.random.randint(bkey1, (big,), 0, num_champions, jnp.int32)
    d_big = jax.random.randint(bkey2, (big,), 0, num_champions, jnp.int32)
    out_big = jax.block_until_ready(
        counter_model_forward(a_big, d_big, prepared, block_rows=128))
    ref_big = reference_forward(a_big, d_big, params)
    assert out_big.shape == (big,)
    assert jnp.allclose(out_big, ref_big, atol=1e-5, rtol=1e-5)

    # Large batch exercising the default big-tile heuristic (even tile count, grid > 1).
    huge = 20000
    hkey1, hkey2 = jax.random.split(jax.random.PRNGKey(2))
    a_h = jax.random.randint(hkey1, (huge,), 0, num_champions, jnp.int32)
    d_h = jax.random.randint(hkey2, (huge,), 0, num_champions, jnp.int32)
    out_h = jax.block_until_ready(counter_model_forward(a_h, d_h, prepared))
    ref_h = reference_forward(a_h, d_h, params)
    assert out_h.shape == (huge,)
    assert jnp.allclose(out_h, ref_h, atol=1e-5, rtol=1e-5)

    print("KERNEL_OK")
</pallas_src>

<mosaic_0001>
module attributes {stable_mosaic.version = 11 : i64} {
  func.func @_counter_kernel(%arg0: i32, %arg1: memref<1x128xi32, #tpu.memory_space<vmem>>, %arg2: memref<32x16xf32, #tpu.memory_space<vmem>>, %arg3: memref<32x16xf32, #tpu.memory_space<vmem>>, %arg4: memref<32x1xf32, #tpu.memory_space<vmem>>, %arg5: memref<32x1xf32, #tpu.memory_space<vmem>>, %arg6: memref<1xf32, #tpu.memory_space<smem>>, %arg7: memref<1x128xf32, #tpu.memory_space<vmem>>) attributes {dimension_semantics = [#tpu.dimension_semantics<parallel>], iteration_bounds = array<i64: 1>, scalar_prefetch = 0 : i64, scratch_operands = 0 : i64, tpu.core_type = #tpu.core_type<tc>, window_params = [{transform_indices = @transform_0, window_bounds = array<i64: 1, 128>}, {pipeline_mode = #tpu.pipeline_mode<synchronous>, transform_indices = @transform_1, window_bounds = array<i64: 32, 16>}, {pipeline_mode = #tpu.pipeline_mode<synchronous>, transform_indices = @transform_2, window_bounds = array<i64: 32, 16>}, {pipeline_mode = #tpu.pipeline_mode<synchronous>, transform_indices = @transform_3, window_bounds = array<i64: 32, 1>}, {pipeline_mode = #tpu.pipeline_mode<synchronous>, transform_indices = @transform_4, window_bounds = array<i64: 32, 1>}, {transform_indices = @transform_5, window_bounds = array<i64: 1>}, {transform_indices = @transform_6, window_bounds = array<i64: 1, 128>}]} {
    %c0 = arith.constant 0 : index
    %c0_0 = arith.constant 0 : index
    %0 = vector.load %arg1[%c0, %c0_0] : memref<1x128xi32, #tpu.memory_space<vmem>>, vector<1x128xi32>
    %c65535_i32 = arith.constant 65535 : i32
    %1 = vector.broadcast %c65535_i32 : i32 to vector<1x128xi32>
    %2 = arith.andi %0, %1 : vector<1x128xi32>
    %c16_i32 = arith.constant 16 : i32
    %3 = vector.broadcast %c16_i32 : i32 to vector<1x128xi32>
    %4 = arith.shrsi %0, %3 : vector<1x128xi32>
    %c65535_i32_1 = arith.constant 65535 : i32
    %5 = vector.broadcast %c65535_i32_1 : i32 to vector<1x128xi32>
    %6 = arith.andi %4, %5 : vector<1x128xi32>
    %7 = tpu.iota {dimensions = array<i32: 0>} : vector<16x128xi32>
    %8 = vector.broadcast %2 : vector<1x128xi32> to vector<16x128xi32>
    %9 = arith.cmpi eq, %7, %8 : vector<16x128xi32>
    %10 = arith.extui %9 : vector<16x128xi1> to vector<16x128xi32>
    %11 = arith.sitofp %10 : vector<16x128xi32> to vector<16x128xf32>
    %12 = vector.broadcast %6 : vector<1x128xi32> to vector<16x128xi32>
    %13 = arith.cmpi eq, %7, %12 : vector<16x128xi32>
    %14 = arith.extui %13 : vector<16x128xi1> to vector<16x128xi32>
    %15 = arith.sitofp %14 : vector<16x128xi32> to vector<16x128xf32>
    %c0_2 = arith.constant 0 : index
    %c0_3 = arith.constant 0 : index
    %16 = vector.load %arg2[%c0_2, %c0_3] : memref<32x16xf32, #tpu.memory_space<vmem>>, vector<32x16xf32>
    %cst = arith.constant dense<0.000000e+00> : vector<32x128xf32>
    %17 = tpu.matmul %16, %11, %cst {dimension_numbers = #tpu.dot_dimension_numbers<[1], [0], [0], [1], [0, 0, 1, 1], [], []>} : vector<32x16xf32>, vector<16x128xf32>, vector<32x128xf32> -> vector<32x128xf32>
    %c0_4 = arith.constant 0 : index
    %c0_5 = arith.constant 0 : index
    %18 = vector.load %arg3[%c0_4, %c0_5] : memref<32x16xf32, #tpu.memory_space<vmem>>, vector<32x16xf32>
    %cst_6 = arith.constant dense<0.000000e+00> : vector<32x128xf32>
    %19 = tpu.matmul %18, %15, %cst_6 {dimension_numbers = #tpu.dot_dimension_numbers<[1], [0], [0], [1], [0, 0, 1, 1], [], []>} : vector<32x16xf32>, vector<16x128xf32>, vector<32x128xf32> -> vector<32x128xf32>
    %20 = arith.addf %17, %19 : vector<32x128xf32>
    %c0_7 = arith.constant 0 : index
    %c0_8 = arith.constant 0 : index
    %21 = vector.load %arg4[%c0_7, %c0_8] : memref<32x1xf32, #tpu.memory_space<vmem>>, vector<32x1xf32>
    %22 = vector.broadcast %21 : vector<32x1xf32> to vector<32x128xf32>
    %23 = arith.addf %20, %22 : vector<32x128xf32>
    %cst_9 = arith.constant 0.000000e+00 : f32
    %24 = vector.broadcast %cst_9 : f32 to vector<32x128xf32>
    %25 = arith.maximumf %23, %24 : vector<32x128xf32>
    %c0_10 = arith.constant 0 : index
    %c0_11 = arith.constant 0 : index
    %26 = vector.load %arg5[%c0_10, %c0_11] : memref<32x1xf32, #tpu.memory_space<vmem>>, vector<32x1xf32>
    %27 = vector.broadcast %26 : vector<32x1xf32> to vector<32x128xf32>
    %28 = arith.mulf %25, %27 : vector<32x128xf32>
    %cst_12 = arith.constant dense<0.000000e+00> : vector<128xf32>
    %29 = vector.multi_reduction <add>, %28, %cst_12 [0] : vector<32x128xf32> to vector<128xf32>
    %30 = vector.shape_cast %29 : vector<128xf32> to vector<1x128xf32>
    %c0_13 = arith.constant 0 : index
    %31 = memref.load %arg6[%c0_13] : memref<1xf32, #tpu.memory_space<smem>>
    %32 = vector.broadcast %31 : f32 to vector<1x128xf32>
    %33 = arith.addf %30, %32 : vector<1x128xf32>
    %34 = arith.negf %33 : vector<1x128xf32>
    %35 = math.exp %34 : vector<1x128xf32>
    %cst_14 = arith.constant 1.000000e+00 : f32
    %36 = vector.broadcast %cst_14 : f32 to vector<1x128xf32>
    %37 = arith.addf %36, %35 : vector<1x128xf32>
    %38 = arith.divf %36, %37 : vector<1x128xf32>
    %c0_15 = arith.constant 0 : index
    %c0_16 = arith.constant 0 : index
    %39 = vector.load %arg7[%c0_15, %c0_16] : memref<1x128xf32, #tpu.memory_space<vmem>>, vector<1x128xf32>
    tpu.vector_store %arg7[%c0_15, %c0_16], %38 {strides = array<i32>} : memref<1x128xf32, #tpu.memory_space<vmem>>, vector<1x128xf32>,
    return
  }
  func.func @transform_0(%arg0: i32) -> (i32, i32) {
    %c0_i32 = arith.constant 0 : i32
    %c0_i32_0 = arith.constant 0 : i32
    return %c0_i32, %arg0 : i32, i32
  }
  func.func @transform_1(%arg0: i32) -> (i32, i32) {
    %c0_i32 = arith.constant 0 : i32
    %c0_i32_0 = arith.constant 0 : i32
    %c0_i32_1 = arith.constant 0 : i32
    return %c0_i32, %c0_i32_0 : i32, i32
  }
  func.func @transform_2(%arg0: i32) -> (i32, i32) {
    %c0_i32 = arith.constant 0 : i32
    %c0_i32_0 = arith.constant 0 : i32
    %c0_i32_1 = arith.constant 0 : i32
    return %c0_i32, %c0_i32_0 : i32, i32
  }
  func.func @transform_3(%arg0: i32) -> (i32, i32) {
    %c0_i32 = arith.constant 0 : i32
    %c0_i32_0 = arith.constant 0 : i32
    %c0_i32_1 = arith.constant 0 : i32
    return %c0_i32, %c0_i32_0 : i32, i32
  }
  func.func @transform_4(%arg0: i32) -> (i32, i32) {
    %c0_i32 = arith.constant 0 : i32
    %c0_i32_0 = arith.constant 0 : i32
    %c0_i32_1 = arith.constant 0 : i32
    return %c0_i32, %c0_i32_0 : i32, i32
  }
  func.func @transform_5(%arg0: i32) -> i32 {
    %c0_i32 = arith.constant 0 : i32
    %c0_i32_0 = arith.constant 0 : i32
    return %c0_i32 : i32
  }
  func.func @transform_6(%arg0: i32) -> (i32, i32) {
    %c0_i32 = arith.constant 0 : i32
    %c0_i32_0 = arith.constant 0 : i32
    return %c0_i32, %arg0 : i32, i32
  }
}

</mosaic_0001>

<bundles_post_ra>
// kernel: tpu_custom_call.1
= control target key start
LH: loop header
LB: loop body
LE: loop exit
PB: predicated region body
PF: predicated region fallthrough
CT: control target
= control target key end

     0   :  { %v29_v1 = vlaneseq  ;;  %vm60_vm0 = vcmask 130048   ;;  %v443_v7 = vmov 0   ;;  %s555_s0 = inlined_call_operand.vmem [shape: s32[1,128], index: 0, kind: input, shape index: {}]   ;;  %s556_s1 = inlined_call_operand.vmem [shape: f32[32,16], index: 1, kind: input, shape index: {}]   ;;  %s557_s2 = inlined_call_operand.vmem [shape: f32[32,16], index: 2, kind: input, shape index: {}]   ;;  %s558_s3 = inlined_call_operand.vmem [shape: f32[32,1], index: 3, kind: input, shape index: {}]   ;;  %s559_s4 = inlined_call_operand.vmem [shape: f32[32,1], index: 4, kind: input, shape index: {}]   ;;  %s560_s5 = inlined_call_operand.<no memory space> [shape: f32[1], index: 5, kind: input, shape index: {}]   ;;  %s561_s6 = inlined_call_operand.hbm [shape: f32[1,128], index: 6, kind: output, shape index: {}]  }
   0x1   :  { %v25_v0 = vld [vmem:[%s555_s0] sm:$0x1]  ;;  %413 = vset.pattern.permute.xlu0 %v443_v7  ;;  %414 = vset.pattern.permute.xlu1 %v443_v7  ;;  %v257_v9 = vld [vmem:[%s558_s3 + $0x10] sm:$0xff]  ;;  %v256_v12 = vld [vmem:[%s558_s3 + $0x8] sm:$0xff] }
   0x2   :  { %v56_v2 = vld [vmem:[%s557_s2] sm:$0xff]  ;;  %v348_v4 = vshrl.u32 %v25_v0, 16  ;;  %v30_v5 = vshrl.u32 %v29_v1, 7  ;;  %v26_v6 = vand.u32 65535, %v25_v0  ;;  %271 = vperm.xlu1 %414, %v257_v9   ;;  %v258_v15 = vld [vmem:[%s558_s3 + $0x18] sm:$0xff] }
   0x3   :  { %382 = vmatprep.mubr.msk.f32.mxu1 %vm60_vm0, %v56_v2  ;;  %v52_v3 = vld [vmem:[%s556_s1] sm:$0xff] }
   0x4   :  { %392 = vmatprep.mubr.msk.f32.mxu0 %vm60_vm0, %v52_v3  ;;  %v255_v8 = vld [vmem:[%s558_s3] sm:$0xff]  ;;  %v31_v10 = vadd.s32 8, %v30_v5  ;;  %v34_v11 = vsub.s32 0, %v30_v5 }
   0x5   :  { %261 = vperm.xlu0 %413, %v255_v8  }
   0x6   :  { %v45_v13 = vrot.slane %v348_v4, %v34_v11  ;;  %v35_v14 = vrot.slane %v26_v6, %v34_v11 }
   0x7   :  { %12 = vsyncpa [#allocation4], 0  ;;  %276 = vperm.xlu1 %414, %v258_v15   ;;  %v287_v16 = vld [vmem:[%s559_s4] sm:$0xff]  ;;  %v444_v17 = vmov 1.0|1.0   ;;  %v288_v18 = vld [vmem:[%s559_s4 + $0x8] sm:$0xff]  ;;  %v325_v3 = vstv %s560_s5 }
   0x8   :  { %vm46_vm1 = vcmp.eq.s32.totalorder %v30_v5, %v45_v13  ;;  %vm47_vm2 = vcmp.eq.s32.totalorder %v31_v10, %v45_v13  ;;  %vm36_vm3 = vcmp.eq.s32.totalorder %v30_v5, %v35_v14  ;;  %vm37_vm4 = vcmp.eq.s32.totalorder %v31_v10, %v35_v14  ;;  %v57_v19 = vld [vmem:[%s557_s2 + $0x8] sm:$0xff]  ;;  %v58_v21 = vld [vmem:[%s557_s2 + $0x10] sm:$0xff]  ;;  %v290_v24 = vld [vmem:[%s559_s4 + $0x18] sm:$0xff] }
   0x9   :  { %266 = vperm.xlu0 %413, %v256_v12   ;;  %vm398_vm5 = vmpackc.low %vm47_vm2, %vm46_vm1  ;;  %v53_v20 = vld [vmem:[%s556_s1 + $0x8] sm:$0xff]  ;;  %v54_v22 = vld [vmem:[%s556_s1 + $0x10] sm:$0xff] }
   0xa   :  { %399 = vmatprep.subr.msk.bf16.mxu1 %vm398_vm5, %v444_v17  ;;  %vm402_vm6 = vmpackc.low %vm37_vm4, %vm36_vm3  ;;  %v289_v23 = vld [vmem:[%s559_s4 + $0x10] sm:$0xff]  ;;  %v59_v25 = vld [vmem:[%s557_s2 + $0x18] sm:$0xff]  ;;  %s445_s4 = smov [#allocation3]  }
   0xb   :  { %403 = vmatprep.subr.msk.bf16.mxu0 %vm402_vm6, %v444_v17  ;;  %401 = vmatpush3.bf16.msk.msra.mxu1 %vm398_vm5, %v444_v17  ;;  %v55_v26 = vld [vmem:[%s556_s1 + $0x18] sm:$0xff]  ;;  %s340_s28 = sshll.u32 %s445_s4, 4  ;;  %s341_s28 = int_to_ptr.vmem [resolvable:$true] %s340_s28 }
   0xc   :  { %405 = vmatpush3.bf16.msk.msra.mxu0 %vm402_vm6, %v444_v17  ;;  %298 = vperm.xlu1 %414, %v288_v18   ;;  %s419_s29 = scalar_lea.vmem %s341_s28, 16  ;;  %s423_s30 = scalar_lea.vmem %s341_s28, 32 }
   0xd   :  { %293 = vperm.xlu0 %413, %v287_v16   ;;  %p420_p0 = scmp.ne.s32.totalorder %s341_s28, %s419_s29  ;;  %p424_p1 = scmp.lt.s32.totalorder %s341_s28, %s341_s28 }
   0xe   :  { %383 = vmatmul.mubr.msk.f32.vlgmr.msra.gmra.mrb[0].mxu1 %vm60_vm0, %v57_v19  ;;  %p425_p2 = scmp.lt.s32.totalorder %s423_s30, %s419_s29 }
   0xf   :  { %393 = vmatmul.mubr.msk.f32.vlgmr.msra.gmra.mrb[0].mxu0 %vm60_vm0, %v53_v20  ;;  %385 = vmatprep.mubr.msk.f32.mxu1 %vm60_vm0, %v58_v21 }
  0x10   :  { %395 = vmatprep.mubr.msk.f32.mxu0 %vm60_vm0, %v54_v22  ;;  %308 = vperm.xlu1 %414, %v290_v24   ;;  %p426_p3 = por %p425_p2, %p424_p1 }
  0x11   :  { %303 = vperm.xlu0 %413, %v289_v23  }
  0x12   :  { %386 = vmatmul.mubr.msk.f32.gmra.mrb[2].mxu1 %vm60_vm0, %v59_v25  ;;  %p427_p4 = pnand %p426_p3, %p420_p0 }
  0x13   :  { %396 = vmatmul.mubr.msk.f32.gmra.mrb[2].mxu0 %vm60_vm0, %v55_v26 }
  0x81   :  { %v272_v28 = vpop.permute.xlu1 %271 }
  0x84   :  { %v262_v27 = vpop.permute.xlu0 %261 }
  0x86   :  { %v277_v30 = vpop.permute.xlu1 %276 }
  0x88   :  { %v267_v29 = vpop.permute.xlu0 %266 }
  0x8b   :  { %v299_v46 = vpop.permute.xlu1 %298 }
  0x8c   :  { %v294_v42 = vpop.permute.xlu0 %293 }
  0x8f   :  { %v309_v58 = vpop.permute.xlu1 %308 }
  0x90   :  { %v304_v56 = vpop.permute.xlu0 %303 }
  0xe1   :  { %v384_v31 = vpop.f32.mrb[0].mxu1 }
  0xe2   :  { %v394_v32 = vpop.f32.mrb[0].mxu0  ;;  %v139_v33 = vpop.f32.mrb[1].mxu1 }
  0xe3   :  { %v242_v34 = vadd.f32 %v394_v32, %v384_v31  ;;  %v236_v35 = vpop.f32.mrb[1].mxu0 }
  0xe4   :  { %v237_v36 = vadd.f32 %v236_v35, %v139_v33 }
  0xe5   :  { %v280_v37 = vadd.f32 %v267_v29, %v242_v34  ;;  %v387_v38 = vpop.f32.mrb[2].mxu1 }
  0xe6   :  { %v279_v39 = vadd.f32 %v262_v27, %v237_v36  ;;  %v397_v40 = vpop.f32.mrb[2].mxu0  ;;  %v149_v41 = vpop.f32.mrb[3].mxu1 }
  0xe7   :  { %v284_v43 = vmax.f32 %v280_v37, 0.0  ;;  %v252_v44 = vadd.f32 %v397_v40, %v387_v38  ;;  %v246_v45 = vpop.f32.mrb[3].mxu0 }
  0xe8   :  { %v283_v47 = vmax.f32 %v279_v39, 0.0  ;;  %v247_v48 = vadd.f32 %v246_v45, %v149_v41 }
  0xe9   :  { %v312_v49 = vmul.f32 %v299_v46, %v284_v43  ;;  %v282_v50 = vadd.f32 %v277_v30, %v252_v44 }
  0xea   :  { %v311_v51 = vmul.f32 %v294_v42, %v283_v47  ;;  %v281_v52 = vadd.f32 %v272_v28, %v247_v48 }
  0xeb   :  { %v286_v54 = vmax.f32 %v282_v50, 0.0 }
  0xec   :  { %v315_v53 = vadd.f32 %v312_v49, %v311_v51  ;;  %v285_v55 = vmax.f32 %v281_v52, 0.0 }
  0xed   :  { %v314_v59 = vmul.f32 %v309_v58, %v286_v54 }
  0xee   :  { %v313_v57 = vmul.f32 %v304_v56, %v285_v55 }
  0xf0   :  { %v316_v60 = vadd.f32 %v315_v53, %v313_v57 }
  0xf2   :  { %v317_v61 = vadd.f32 %v316_v60, %v314_v59 }
  0xf4   :  { %v318_v62 = vrot.slane %v317_v61, 4 }
  0xf6   :  { %v319_v63 = vadd.f32 %v318_v62, %v317_v61 }
  0xf8   :  { %v320_v0 = vrot.slane %v319_v63, 2 }
  0xfa   :  { %v321_v1 = vadd.f32 %v320_v0, %v319_v63 }
  0xfc   :  { %v322_v2 = vrot.slane %v321_v1, 1 }
  0xfe   :  { %v323_v4 = vadd.f32 %v322_v2, %v321_v1 }
 0x100   :  { %v326_v5 = vadd.f32 %v325_v3, %v323_v4 }
 0x102   :  { %v365_v6 = vmul.f32 -1.442695, %v326_v5 }
 0x104   :  { %415 = vpow2.f32 %v365_v6 }
 0x10e   :  { %v416_v7 = vpop.eup %415 }
 0x10f   :  { %v330_v8 = vadd.f32 1.0, %v416_v7 }
 0x111   :  { %417 = vrcp.f32 %v330_v8 }
 0x11b   :  { %v418_v9 = vpop.eup %417 }
 0x11c   :  { %333 = vst [vmem:[#allocation3] sm:$0x1] %v418_v9 }
 0x11d   :  { %430 = shalt.err (!%p427_p4)
}
 0x11e   :  { %s431_s8 = scalar_lea.hbm %s561_s6, 16 }
 0x11f   :  { %p432_p5 = scmp.ne.s32.totalorder %s561_s6, %s431_s8  ;;  %p435_p6 = scmp.lt.u32.totalorder %s431_s8, %s561_s6 }
 0x121   :  { %p437_p7 = pnand %p435_p6, %p432_p5 }
 0x123   :  { %440 = shalt.err (!%p437_p7)
}
 0x124   :  { %343 = dma.vmem_to_hbm [thread:$0]  %s341_s28, 16, %s561_s6, [#allocation4]  }
 0x125   :  { %441 = dma.done.wait [#allocation4], 16  }
 0x126   :  { %442 = vsyncadd [#allocation4], 4294967280 }
 0x127   :  { %347 = vsyncpa [#allocation4], 1 }

</bundles_post_ra>
